<compile_context>
chip_gen: v7x
topology: tpu7x:2x2x1
jax: 0.10.0
libtpu: 0.0.40
codegen_flags: <defaults>
</compile_context>

<pallas_src>
import functools

import jax
import jax.numpy as jnp
from jax.experimental import pallas as pl
from jax.experimental.pallas import tpu as pltpu

N_EMBD = 32
N_HEAD = 4
HEAD_DIM = N_EMBD // N_HEAD
RMS_EPS = 1e-6


def _rmsnorm(x, w):
    # x: (rows, C) f32, w: (1, C) f32
    ms = jnp.mean(x * x, axis=-1, keepdims=True)
    return x * jax.lax.rsqrt(ms + RMS_EPS) * w


def encoder_block_kernel(x_ref, ln1_ref, wqkv_ref, wattn_ref,
                         ln2_ref, wfc_ref, wmlp_ref, o_ref, *, bb, seq):
    C = N_EMBD
    x = x_ref[...]                                              # (bb*seq, C) f32

    # ---------------- attention branch ----------------
    h = _rmsnorm(x, ln1_ref[...]).astype(jnp.bfloat16)
    qkv = jnp.dot(h, wqkv_ref[...],
                  preferred_element_type=jnp.float32)           # (bb*seq, 3C) f32
    qkv = qkv.reshape(bb, seq, 3 * C)

    scale = 1.0 / (HEAD_DIM ** 0.5)
    q = qkv[:, :, 0:C] * scale                                  # scale folded into q
    k = qkv[:, :, C:2 * C]
    v = qkv[:, :, 2 * C:3 * C]

    # Pack heads into the leading (batch) axis: (N_HEAD*bb, seq, HEAD_DIM).
    def pack_heads(t):
        return jnp.concatenate(
            [t[:, :, hd * HEAD_DIM:(hd + 1) * HEAD_DIM] for hd in range(N_HEAD)],
            axis=0).astype(jnp.bfloat16)

    qh = pack_heads(q)
    kh = pack_heads(k)
    vh = pack_heads(v)

    # One batched score matmul + softmax + value matmul for all (head, batch) pairs.
    att = jnp.einsum("nqd,nkd->nqk", qh, kh,
                     preferred_element_type=jnp.float32)        # (H*bb, seq, seq)
    att = att - jnp.max(att, axis=-1, keepdims=True)            # stable softmax, no mask
    p = jnp.exp(att)
    p = p * pl.reciprocal(jnp.sum(p, axis=-1, keepdims=True), approx=True)
    yh = jnp.einsum("nqk,nkd->nqd", p.astype(jnp.bfloat16), vh,
                    preferred_element_type=jnp.float32)         # (H*bb, seq, HEAD_DIM)

    # Unpack heads back onto the lane (embedding) axis -> (bb, seq, C).
    y = jnp.concatenate([yh[hd * bb:(hd + 1) * bb] for hd in range(N_HEAD)], axis=-1)
    y = y.reshape(bb * seq, C).astype(jnp.bfloat16)
    y = jnp.dot(y, wattn_ref[...], preferred_element_type=jnp.float32)   # c_proj
    x1 = x + y                                                  # residual 1 (f32)

    # ---------------- MLP branch ----------------
    h2 = _rmsnorm(x1, ln2_ref[...]).astype(jnp.bfloat16)
    g = jnp.dot(h2, wfc_ref[...], preferred_element_type=jnp.float32)    # (rows, 4C)
    g = g * jax.nn.sigmoid(g)                                   # SiLU (f32)
    m = jnp.dot(g.astype(jnp.bfloat16), wmlp_ref[...],
                preferred_element_type=jnp.float32)             # (rows, C)

    o_ref[...] = x1 + m                                         # residual 2, single slab store


def encoder_block(x, params, *, batch_block=None):
    B, T, C = x.shape
    assert C == N_EMBD
    if batch_block is None:
        batch_block = B            # whole problem in one block; fits VMEM easily here
    assert B % batch_block == 0
    n_rows = batch_block * T

    x2 = x.reshape(B * T, C)       # flat rows -> single matmul over all tokens

    def wspec(shape):
        # Whole-array weight block, constant index across the grid.
        return pl.BlockSpec(shape, lambda i, _n=len(shape): (0,) * _n)

    grid_spec = pltpu.PrefetchScalarGridSpec(
        num_scalar_prefetch=0,
        grid=(B // batch_block,),
        in_specs=[
            pl.BlockSpec((n_rows, C), lambda i: (i, 0)),        # x rows for this batch block
            wspec((1, C)),                                      # ln_1 weight (f32)
            wspec((C, 3 * C)),                                  # attn.c_attn weight (bf16, pre-T)
            wspec((C, C)),                                      # attn.c_proj weight (bf16, pre-T)
            wspec((1, C)),                                      # ln_2 weight (f32)
            wspec((C, 4 * C)),                                  # mlp.c_fc weight (bf16, pre-T)
            wspec((4 * C, C)),                                  # mlp.c_proj weight (bf16, pre-T)
        ],
        out_specs=pl.BlockSpec((n_rows, C), lambda i: (i, 0)),
    )

    kernel = functools.partial(encoder_block_kernel, bb=batch_block, seq=T)

    out = pl.pallas_call(
        kernel,
        out_shape=jax.ShapeDtypeStruct((B * T, C), jnp.float32),
        grid_spec=grid_spec,
        compiler_params=pltpu.CompilerParams(dimension_semantics=("parallel",)),
    )(x2, params["ln1"], params["wqkv"], params["wattn"],
      params["ln2"], params["wfc"], params["wmlp"])

    return out.reshape(B, T, C)


# ---------------- pure-JAX reference (same math, f32 with bf16-quantized weights) ----------------
def encoder_block_ref(x, params):
    def rms(v, w):
        return v * jax.lax.rsqrt(jnp.mean(v * v, axis=-1, keepdims=True) + RMS_EPS) * w

    B, T, C = x.shape
    wqkv = params["wqkv"].astype(jnp.float32)
    wattn = params["wattn"].astype(jnp.float32)
    wfc = params["wfc"].astype(jnp.float32)
    wmlp = params["wmlp"].astype(jnp.float32)

    h = rms(x, params["ln1"])
    qkv = h @ wqkv
    q, k, v = jnp.split(qkv, 3, axis=-1)
    q = q.reshape(B, T, N_HEAD, HEAD_DIM).transpose(0, 2, 1, 3)
    k = k.reshape(B, T, N_HEAD, HEAD_DIM).transpose(0, 2, 1, 3)
    v = v.reshape(B, T, N_HEAD, HEAD_DIM).transpose(0, 2, 1, 3)
    att = jnp.einsum("bhqd,bhkd->bhqk", q, k) / (HEAD_DIM ** 0.5)
    att = jax.nn.softmax(att, axis=-1)
    y = jnp.einsum("bhqk,bhkd->bhqd", att, v)
    y = y.transpose(0, 2, 1, 3).reshape(B, T, C) @ wattn
    x1 = x + y
    h2 = rms(x1, params["ln2"])
    g = h2 @ wfc
    g = g * jax.nn.sigmoid(g)
    return x1 + g @ wmlp


def init_params(key):
    ks = jax.random.split(key, 4)
    scale = 0.02
    return {
        "ln1": jnp.ones((1, N_EMBD), jnp.float32),
        "wqkv": (scale * jax.random.normal(ks[0], (N_EMBD, 3 * N_EMBD), jnp.float32)).astype(jnp.bfloat16),
        "wattn": (scale * jax.random.normal(ks[1], (N_EMBD, N_EMBD), jnp.float32)).astype(jnp.bfloat16),
        "ln2": jnp.ones((1, N_EMBD), jnp.float32),
        "wfc": (scale * jax.random.normal(ks[2], (N_EMBD, 4 * N_EMBD), jnp.float32)).astype(jnp.bfloat16),
        "wmlp": (scale * jax.random.normal(ks[3], (4 * N_EMBD, N_EMBD), jnp.float32)).astype(jnp.bfloat16),
    }


if __name__ == "__main__":
    key = jax.random.PRNGKey(0)
    k_x, k_p = jax.random.split(key)
    B, T, C = 2, 8, N_EMBD
    x = jax.random.normal(k_x, (B, T, C), jnp.float32)
    params = init_params(k_p)

    out = encoder_block(x, params)
    out = jax.block_until_ready(out)

    ref = jax.block_until_ready(encoder_block_ref(x, params))
    max_err = float(jnp.max(jnp.abs(out - ref)))
    assert out.shape == (B, T, C)
    assert max_err < 1e-2, f"mismatch vs reference: {max_err}"

    print("KERNEL_OK")
</pallas_src>

<mosaic_0001>
module attributes {stable_mosaic.version = 11 : i64} {
  func.func @encoder_block_kernel(%arg0: i32, %arg1: memref<16x32xf32, #tpu.memory_space<vmem>>, %arg2: memref<1x32xf32, #tpu.memory_space<vmem>>, %arg3: memref<32x96xbf16, #tpu.memory_space<vmem>>, %arg4: memref<32x32xbf16, #tpu.memory_space<vmem>>, %arg5: memref<1x32xf32, #tpu.memory_space<vmem>>, %arg6: memref<32x128xbf16, #tpu.memory_space<vmem>>, %arg7: memref<128x32xbf16, #tpu.memory_space<vmem>>, %arg8: memref<16x32xf32, #tpu.memory_space<vmem>>) attributes {dimension_semantics = [#tpu.dimension_semantics<parallel>], iteration_bounds = array<i64: 1>, scalar_prefetch = 0 : i64, scratch_operands = 0 : i64, tpu.core_type = #tpu.core_type<tc>, window_params = [{transform_indices = @transform_0, window_bounds = array<i64: 16, 32>}, {pipeline_mode = #tpu.pipeline_mode<synchronous>, transform_indices = @transform_1, window_bounds = array<i64: 1, 32>}, {pipeline_mode = #tpu.pipeline_mode<synchronous>, transform_indices = @transform_2, window_bounds = array<i64: 32, 96>}, {pipeline_mode = #tpu.pipeline_mode<synchronous>, transform_indices = @transform_3, window_bounds = array<i64: 32, 32>}, {pipeline_mode = #tpu.pipeline_mode<synchronous>, transform_indices = @transform_4, window_bounds = array<i64: 1, 32>}, {pipeline_mode = #tpu.pipeline_mode<synchronous>, transform_indices = @transform_5, window_bounds = array<i64: 32, 128>}, {pipeline_mode = #tpu.pipeline_mode<synchronous>, transform_indices = @transform_6, window_bounds = array<i64: 128, 32>}, {transform_indices = @transform_7, window_bounds = array<i64: 16, 32>}]} {
    %c0 = arith.constant 0 : index
    %c0_0 = arith.constant 0 : index
    %0 = vector.load %arg1[%c0, %c0_0] : memref<16x32xf32, #tpu.memory_space<vmem>>, vector<16x32xf32>
    %c0_1 = arith.constant 0 : index
    %c0_2 = arith.constant 0 : index
    %1 = vector.load %arg2[%c0_1, %c0_2] : memref<1x32xf32, #tpu.memory_space<vmem>>, vector<1x32xf32>
    %2 = arith.mulf %0, %0 : vector<16x32xf32>
    %cst = arith.constant dense<0.000000e+00> : vector<16xf32>
    %3 = vector.multi_reduction <add>, %2, %cst [1] : vector<16x32xf32> to vector<16xf32>
    %4 = vector.shape_cast %3 : vector<16xf32> to vector<16x1xf32>
    %cst_3 = arith.constant 3.200000e+01 : f32
    %5 = vector.broadcast %cst_3 : f32 to vector<16x1xf32>
    %6 = arith.divf %4, %5 : vector<16x1xf32>
    %cst_4 = arith.constant 9.99999997E-7 : f32
    %7 = vector.broadcast %cst_4 : f32 to vector<16x1xf32>
    %8 = arith.addf %6, %7 : vector<16x1xf32>
    %9 = math.rsqrt %8 : vector<16x1xf32>
    %10 = vector.broadcast %9 : vector<16x1xf32> to vector<16x32xf32>
    %11 = arith.mulf %0, %10 : vector<16x32xf32>
    %12 = vector.broadcast %1 : vector<1x32xf32> to vector<16x32xf32>
    %13 = arith.mulf %11, %12 : vector<16x32xf32>
    %14 = arith.truncf %13 : vector<16x32xf32> to vector<16x32xbf16>
    %c0_5 = arith.constant 0 : index
    %c0_6 = arith.constant 0 : index
    %15 = vector.load %arg3[%c0_5, %c0_6] : memref<32x96xbf16, #tpu.memory_space<vmem>>, vector<32x96xbf16>
    %cst_7 = arith.constant dense<0.000000e+00> : vector<16x96xf32>
    %16 = tpu.matmul %14, %15, %cst_7 {dimension_numbers = #tpu.dot_dimension_numbers<[1], [0], [0], [1], [0, 0, 1, 1], [], []>} : vector<16x32xbf16>, vector<32x96xbf16>, vector<16x96xf32> -> vector<16x96xf32>
    %17 = vector.shape_cast %16 : vector<16x96xf32> to vector<2x8x96xf32>
    %18 = vector.extract_strided_slice %17 {offsets = [0, 0, 0], sizes = [2, 8, 32], strides = [1, 1, 1]} : vector<2x8x96xf32> to vector<2x8x32xf32>
    %cst_8 = arith.constant 0.353553385 : f32
    %19 = vector.broadcast %cst_8 : f32 to vector<2x8x32xf32>
    %20 = arith.mulf %18, %19 : vector<2x8x32xf32>
    %21 = vector.extract_strided_slice %17 {offsets = [0, 0, 32], sizes = [2, 8, 32], strides = [1, 1, 1]} : vector<2x8x96xf32> to vector<2x8x32xf32>
    %22 = vector.extract_strided_slice %17 {offsets = [0, 0, 64], sizes = [2, 8, 32], strides = [1, 1, 1]} : vector<2x8x96xf32> to vector<2x8x32xf32>
    %23 = vector.extract_strided_slice %20 {offsets = [0, 0, 0], sizes = [2, 8, 8], strides = [1, 1, 1]} : vector<2x8x32xf32> to vector<2x8x8xf32>
    %24 = vector.extract_strided_slice %20 {offsets = [0, 0, 8], sizes = [2, 8, 8], strides = [1, 1, 1]} : vector<2x8x32xf32> to vector<2x8x8xf32>
    %25 = vector.extract_strided_slice %20 {offsets = [0, 0, 16], sizes = [2, 8, 8], strides = [1, 1, 1]} : vector<2x8x32xf32> to vector<2x8x8xf32>
    %26 = vector.extract_strided_slice %20 {offsets = [0, 0, 24], sizes = [2, 8, 8], strides = [1, 1, 1]} : vector<2x8x32xf32> to vector<2x8x8xf32>
    %27 = tpu.concatenate %23, %24, %25, %26 in 0 : vector<2x8x8xf32>, vector<2x8x8xf32>, vector<2x8x8xf32>, vector<2x8x8xf32> -> vector<8x8x8xf32>
    %28 = arith.truncf %27 : vector<8x8x8xf32> to vector<8x8x8xbf16>
    %29 = vector.extract_strided_slice %21 {offsets = [0, 0, 0], sizes = [2, 8, 8], strides = [1, 1, 1]} : vector<2x8x32xf32> to vector<2x8x8xf32>
    %30 = vector.extract_strided_slice %21 {offsets = [0, 0, 8], sizes = [2, 8, 8], strides = [1, 1, 1]} : vector<2x8x32xf32> to vector<2x8x8xf32>
    %31 = vector.extract_strided_slice %21 {offsets = [0, 0, 16], sizes = [2, 8, 8], strides = [1, 1, 1]} : vector<2x8x32xf32> to vector<2x8x8xf32>
    %32 = vector.extract_strided_slice %21 {offsets = [0, 0, 24], sizes = [2, 8, 8], strides = [1, 1, 1]} : vector<2x8x32xf32> to vector<2x8x8xf32>
    %33 = tpu.concatenate %29, %30, %31, %32 in 0 : vector<2x8x8xf32>, vector<2x8x8xf32>, vector<2x8x8xf32>, vector<2x8x8xf32> -> vector<8x8x8xf32>
    %34 = arith.truncf %33 : vector<8x8x8xf32> to vector<8x8x8xbf16>
    %35 = vector.extract_strided_slice %22 {offsets = [0, 0, 0], sizes = [2, 8, 8], strides = [1, 1, 1]} : vector<2x8x32xf32> to vector<2x8x8xf32>
    %36 = vector.extract_strided_slice %22 {offsets = [0, 0, 8], sizes = [2, 8, 8], strides = [1, 1, 1]} : vector<2x8x32xf32> to vector<2x8x8xf32>
    %37 = vector.extract_strided_slice %22 {offsets = [0, 0, 16], sizes = [2, 8, 8], strides = [1, 1, 1]} : vector<2x8x32xf32> to vector<2x8x8xf32>
    %38 = vector.extract_strided_slice %22 {offsets = [0, 0, 24], sizes = [2, 8, 8], strides = [1, 1, 1]} : vector<2x8x32xf32> to vector<2x8x8xf32>
    %39 = tpu.concatenate %35, %36, %37, %38 in 0 : vector<2x8x8xf32>, vector<2x8x8xf32>, vector<2x8x8xf32>, vector<2x8x8xf32> -> vector<8x8x8xf32>
    %40 = arith.truncf %39 : vector<8x8x8xf32> to vector<8x8x8xbf16>
    "tpu.trace_start"() <{level = 10 : i32, message = "nqd,nkd->nqk"}> : () -> ()
    %cst_9 = arith.constant dense<0.000000e+00> : vector<8x8x8xf32>
    %41 = tpu.matmul %28, %34, %cst_9 {dimension_numbers = #tpu.dot_dimension_numbers<[2], [2], [1], [1], [0, 0, 0, 1, 1, 1], [0], [0]>} : vector<8x8x8xbf16>, vector<8x8x8xbf16>, vector<8x8x8xf32> -> vector<8x8x8xf32>
    "tpu.trace_stop"() : () -> ()
    %cst_10 = arith.constant dense<0xFF800000> : vector<8x8xf32>
    %42 = vector.multi_reduction <maximumf>, %41, %cst_10 [2] : vector<8x8x8xf32> to vector<8x8xf32>
    %43 = vector.shape_cast %42 : vector<8x8xf32> to vector<8x8x1xf32>
    %44 = vector.broadcast %43 : vector<8x8x1xf32> to vector<8x8x8xf32>
    %45 = arith.subf %41, %44 : vector<8x8x8xf32>
    %46 = math.exp %45 : vector<8x8x8xf32>
    %cst_11 = arith.constant dense<0.000000e+00> : vector<8x8xf32>
    %47 = vector.multi_reduction <add>, %46, %cst_11 [2] : vector<8x8x8xf32> to vector<8x8xf32>
    %48 = vector.shape_cast %47 : vector<8x8xf32> to vector<8x8x1xf32>
    %49 = tpu.reciprocal %48 {approx = true} : vector<8x8x1xf32> -> vector<8x8x1xf32>
    %50 = vector.broadcast %49 : vector<8x8x1xf32> to vector<8x8x8xf32>
    %51 = arith.mulf %46, %50 : vector<8x8x8xf32>
    %52 = arith.truncf %51 : vector<8x8x8xf32> to vector<8x8x8xbf16>
    "tpu.trace_start"() <{level = 10 : i32, message = "nqk,nkd->nqd"}> : () -> ()
    %cst_12 = arith.constant dense<0.000000e+00> : vector<8x8x8xf32>
    %53 = tpu.matmul %52, %40, %cst_12 {dimension_numbers = #tpu.dot_dimension_numbers<[2], [1], [1], [2], [0, 0, 0, 1, 1, 2], [0], [0]>} : vector<8x8x8xbf16>, vector<8x8x8xbf16>, vector<8x8x8xf32> -> vector<8x8x8xf32>
    "tpu.trace_stop"() : () -> ()
    %54 = vector.extract_strided_slice %53 {offsets = [0, 0, 0], sizes = [2, 8, 8], strides = [1, 1, 1]} : vector<8x8x8xf32> to vector<2x8x8xf32>
    %55 = vector.extract_strided_slice %53 {offsets = [2, 0, 0], sizes = [2, 8, 8], strides = [1, 1, 1]} : vector<8x8x8xf32> to vector<2x8x8xf32>
    %56 = vector.extract_strided_slice %53 {offsets = [4, 0, 0], sizes = [2, 8, 8], strides = [1, 1, 1]} : vector<8x8x8xf32> to vector<2x8x8xf32>
    %57 = vector.extract_strided_slice %53 {offsets = [6, 0, 0], sizes = [2, 8, 8], strides = [1, 1, 1]} : vector<8x8x8xf32> to vector<2x8x8xf32>
    %58 = tpu.concatenate %54, %55, %56, %57 in 2 : vector<2x8x8xf32>, vector<2x8x8xf32>, vector<2x8x8xf32>, vector<2x8x8xf32> -> vector<2x8x32xf32>
    %59 = vector.shape_cast %58 : vector<2x8x32xf32> to vector<16x32xf32>
    %60 = arith.truncf %59 : vector<16x32xf32> to vector<16x32xbf16>
    %c0_13 = arith.constant 0 : index
    %c0_14 = arith.constant 0 : index
    %61 = vector.load %arg4[%c0_13, %c0_14] : memref<32x32xbf16, #tpu.memory_space<vmem>>, vector<32x32xbf16>
    %cst_15 = arith.constant dense<0.000000e+00> : vector<16x32xf32>
    %62 = tpu.matmul %60, %61, %cst_15 {dimension_numbers = #tpu.dot_dimension_numbers<[1], [0], [0], [1], [0, 0, 1, 1], [], []>} : vector<16x32xbf16>, vector<32x32xbf16>, vector<16x32xf32> -> vector<16x32xf32>
    %63 = arith.addf %0, %62 : vector<16x32xf32>
    %c0_16 = arith.constant 0 : index
    %c0_17 = arith.constant 0 : index
    %64 = vector.load %arg5[%c0_16, %c0_17] : memref<1x32xf32, #tpu.memory_space<vmem>>, vector<1x32xf32>
    %65 = arith.mulf %63, %63 : vector<16x32xf32>
    %cst_18 = arith.constant dense<0.000000e+00> : vector<16xf32>
    %66 = vector.multi_reduction <add>, %65, %cst_18 [1] : vector<16x32xf32> to vector<16xf32>
    %67 = vector.shape_cast %66 : vector<16xf32> to vector<16x1xf32>
    %cst_19 = arith.constant 3.200000e+01 : f32
    %68 = vector.broadcast %cst_19 : f32 to vector<16x1xf32>
    %69 = arith.divf %67, %68 : vector<16x1xf32>
    %cst_20 = arith.constant 9.99999997E-7 : f32
    %70 = vector.broadcast %cst_20 : f32 to vector<16x1xf32>
    %71 = arith.addf %69, %70 : vector<16x1xf32>
    %72 = math.rsqrt %71 : vector<16x1xf32>
    %73 = vector.broadcast %72 : vector<16x1xf32> to vector<16x32xf32>
    %74 = arith.mulf %63, %73 : vector<16x32xf32>
    %75 = vector.broadcast %64 : vector<1x32xf32> to vector<16x32xf32>
    %76 = arith.mulf %74, %75 : vector<16x32xf32>
    %77 = arith.truncf %76 : vector<16x32xf32> to vector<16x32xbf16>
    %c0_21 = arith.constant 0 : index
    %c0_22 = arith.constant 0 : index
    %78 = vector.load %arg6[%c0_21, %c0_22] : memref<32x128xbf16, #tpu.memory_space<vmem>>, vector<32x128xbf16>
    %cst_23 = arith.constant dense<0.000000e+00> : vector<16x128xf32>
    %79 = tpu.matmul %77, %78, %cst_23 {dimension_numbers = #tpu.dot_dimension_numbers<[1], [0], [0], [1], [0, 0, 1, 1], [], []>} : vector<16x32xbf16>, vector<32x128xbf16>, vector<16x128xf32> -> vector<16x128xf32>
    %80 = arith.negf %79 : vector<16x128xf32>
    %81 = math.exp %80 : vector<16x128xf32>
    %cst_24 = arith.constant 1.000000e+00 : f32
    %82 = vector.broadcast %cst_24 : f32 to vector<16x128xf32>
    %83 = arith.addf %82, %81 : vector<16x128xf32>
    %84 = arith.divf %82, %83 : vector<16x128xf32>
    %85 = arith.mulf %79, %84 : vector<16x128xf32>
    %86 = arith.truncf %85 : vector<16x128xf32> to vector<16x128xbf16>
    %c0_25 = arith.constant 0 : index
    %c0_26 = arith.constant 0 : index
    %87 = vector.load %arg7[%c0_25, %c0_26] : memref<128x32xbf16, #tpu.memory_space<vmem>>, vector<128x32xbf16>
    %cst_27 = arith.constant dense<0.000000e+00> : vector<16x32xf32>
    %88 = tpu.matmul %86, %87, %cst_27 {dimension_numbers = #tpu.dot_dimension_numbers<[1], [0], [0], [1], [0, 0, 1, 1], [], []>} : vector<16x128xbf16>, vector<128x32xbf16>, vector<16x32xf32> -> vector<16x32xf32>
    %89 = arith.addf %63, %88 : vector<16x32xf32>
    %c0_28 = arith.constant 0 : index
    %c0_29 = arith.constant 0 : index
    %90 = vector.load %arg8[%c0_28, %c0_29] : memref<16x32xf32, #tpu.memory_space<vmem>>, vector<16x32xf32>
    tpu.vector_store %arg8[%c0_28, %c0_29], %89 {strides = array<i32>} : memref<16x32xf32, #tpu.memory_space<vmem>>, vector<16x32xf32>,
    return
  }
  func.func @transform_0(%arg0: i32) -> (i32, i32) {
    %c0_i32 = arith.constant 0 : i32
    %c0_i32_0 = arith.constant 0 : i32
    return %arg0, %c0_i32 : i32, i32
  }
  func.func @transform_1(%arg0: i32) -> (i32, i32) {
    %c0_i32 = arith.constant 0 : i32
    %c0_i32_0 = arith.constant 0 : i32
    %c0_i32_1 = arith.constant 0 : i32
    return %c0_i32, %c0_i32_0 : i32, i32
  }
  func.func @transform_2(%arg0: i32) -> (i32, i32) {
    %c0_i32 = arith.constant 0 : i32
    %c0_i32_0 = arith.constant 0 : i32
    %c0_i32_1 = arith.constant 0 : i32
    return %c0_i32, %c0_i32_0 : i32, i32
  }
  func.func @transform_3(%arg0: i32) -> (i32, i32) {
    %c0_i32 = arith.constant 0 : i32
    %c0_i32_0 = arith.constant 0 : i32
    %c0_i32_1 = arith.constant 0 : i32
    return %c0_i32, %c0_i32_0 : i32, i32
  }
  func.func @transform_4(%arg0: i32) -> (i32, i32) {
    %c0_i32 = arith.constant 0 : i32
    %c0_i32_0 = arith.constant 0 : i32
    %c0_i32_1 = arith.constant 0 : i32
    return %c0_i32, %c0_i32_0 : i32, i32
  }
  func.func @transform_5(%arg0: i32) -> (i32, i32) {
    %c0_i32 = arith.constant 0 : i32
    %c0_i32_0 = arith.constant 0 : i32
    %c0_i32_1 = arith.constant 0 : i32
    return %c0_i32, %c0_i32_0 : i32, i32
  }
  func.func @transform_6(%arg0: i32) -> (i32, i32) {
    %c0_i32 = arith.constant 0 : i32
    %c0_i32_0 = arith.constant 0 : i32
    %c0_i32_1 = arith.constant 0 : i32
    return %c0_i32, %c0_i32_0 : i32, i32
  }
  func.func @transform_7(%arg0: i32) -> (i32, i32) {
    %c0_i32 = arith.constant 0 : i32
    %c0_i32_0 = arith.constant 0 : i32
    return %arg0, %c0_i32 : i32, i32
  }
}

</mosaic_0001>

<bundles_post_ra>
// kernel: tpu_custom_call.1
= control target key start
LH: loop header
LB: loop body
LE: loop exit
PB: predicated region body
PF: predicated region fallthrough
CT: control target
= control target key end

     0   :  { %vm33_vm0 = vcmask 261120   ;;  %s2092_s0 = inlined_call_operand.vmem [shape: f32[16,32], index: 0, kind: input, shape index: {}]   ;;  %s2093_s1 = inlined_call_operand.vmem [shape: f32[1,32], index: 1, kind: input, shape index: {}]   ;;  %s2094_s2 = inlined_call_operand.vmem [shape: bf16[32,96], index: 2, kind: input, shape index: {}]   ;;  %s2095_s3 = inlined_call_operand.vmem [shape: bf16[32,32], index: 3, kind: input, shape index: {}]   ;;  %s2096_s4 = inlined_call_operand.vmem [shape: f32[1,32], index: 4, kind: input, shape index: {}]   ;;  %s2097_s5 = inlined_call_operand.vmem [shape: bf16[32,128], index: 5, kind: input, shape index: {}]   ;;  %s2098_s6 = inlined_call_operand.vmem [shape: bf16[128,32], index: 6, kind: input, shape index: {}]   ;;  %s2099_s7 = inlined_call_operand.hbm [shape: f32[16,32], index: 7, kind: output, shape index: {}]  }
   0x1   :  { %v1796_v0 = vld [vmem:[%s2092_s0] sm:$0xff]  ;;  %v1801_v1 = vld [vmem:[%s2092_s0 + $0x8] sm:$0xff] }
   0x2   :  { %v31_v2 = vmul.f32 %v1796_v0, %v1796_v0  ;;  %v32_v3 = vmul.f32 %v1801_v1, %v1801_v1 }
   0x4   :  { %v34_v4 = vsel %vm33_vm0, %v31_v2, 0.0  ;;  %v37_v5 = vsel %vm33_vm0, %v32_v3, 0.0 }
   0x5   :  { %35 = vadd.xlane.f32.xlu0 %v34_v4 }
   0x9   :  { %38 = vadd.xlane.f32.xlu0 %v37_v5 }
   0xa   :  { %12 = vsyncpa [#allocation3], 0  ;;  %v1655_v6 = vld [vmem:[%s2094_s2] sm:$0xff]   ;;  %v1741_v7 = vmov 0.0   ;;  %vm1742_vm1 = vmmov 0   ;;  %v1656_v8 = vld [vmem:[%s2094_s2 + $0x8] sm:$0xff]  }
   0xb   :  { %1458 = vmatprep.subr.bf16.mxu0 %v1741_v7  ;;  %1462 = vmatprep.mubr.msk.bf16.mxu0 %vm1742_vm1, %v1741_v7  ;;  %v1371_v18 = vld [vmem:[%s2093_s1] ss:$0 sm:$0xff]  ;;  %s1743_s9 = smov 104   ;;  %s1744_s1 = smov 120   ;;  %vm179_vm2 = vcmask 64512   ;;  %vm670_vm3 = vcmask 1043456  }
   0xc   :  { %1459 = vmatpush3.bf16.msra.mxu0 %v1655_v6  ;;  %1478 = vmatprep.subr.bf16.mxu1 %v1741_v7  ;;  %s1745_s10 = smov 112   ;;  %s1746_s11 = smov 96   ;;  %vm1076_vm4 = vcmask 130048   ;;  %vm1079_vm5 = vcmask 195584  }
   0xd   :  { %1460 = vmatprep.subr.bf16.mxu0 %v1741_v7  ;;  %1480 = vmatprep.mubr.msk.bf16.mxu1 %vm1742_vm1, %v1741_v7  ;;  %s1747_s12 = smov 64   ;;  %s1748_s13 = smov 8  }
   0xe   :  { %s1749_s18 = smov 16   ;;  %s1750_s19 = smov 24  }
  0x10   :  { %1461 = vmatpush3.bf16.msra.mxu0 %v1656_v8 }
  0x11   :  { %1466 = vmatprep.subr.bf16.mxu0 %v1741_v7 }
  0x92   :  { %v36_v9 = vpop.xlane.xlu0 %35 }
  0x93   :  { %v41_v10 = vmul.f32 0.03125, %v36_v9 }
  0x95   :  { %v43_v11 = vadd.f32 1e-06, %v41_v10 }
  0x96   :  { %v39_v12 = vpop.xlane.xlu0 %38 }
  0x97   :  { %1669 = vrsqrt.f32 %v43_v11  ;;  %v42_v13 = vmul.f32 0.03125, %v39_v12 }
  0x99   :  { %v44_v14 = vadd.f32 1e-06, %v42_v13 }
  0x9b   :  { %1671 = vrsqrt.f32 %v44_v14 }
  0xa1   :  { %v1670_v15 = vpop.eup %1669 }
  0xa2   :  { %v47_v16 = vmul.f32 %v1670_v15, %v1796_v0 }
  0xa4   :  { %v55_v20 = vmul.f32 %v1371_v18, %v47_v16 }
  0xa5   :  { %v1672_v17 = vpop.eup %1671 }
  0xa6   :  { %v48_v19 = vmul.f32 %v1672_v17, %v1801_v1 }
  0xa8   :  { %v56_v21 = vmul.f32 %v1371_v18, %v48_v19 }
  0xaa   :  { %v57_v22 = vpack.c.bf16 %v56_v21, %v55_v20 }
  0xac   :  { %1463 = vmatmul.mubr.msk.bf16.vlgmr.msra.gmra.mrb[0].mxu0 %vm33_vm0, %v57_v22 }
  0xad   :  { %1468 = vmatprep.mubr.msk.bf16.mxu0 %vm1742_vm1, %v1741_v7 }
 0x17f   :  { %v111_v23 = vpop.f32.mrb[0].mxu0 }
 0x180   :  { %v1464_v24 = vpop.f32.mrb[1].mxu0  ;;  %v118_v25 = vmul.f32 0.35355338, %v111_v23  ;;  %v168_v31 = vpack.c.bf16 %v111_v23, %v111_v23 }
 0x181   :  { %v114_v26 = vpop.f32.mrb[2].mxu0 }
 0x182   :  { %v119_v27 = vmul.f32 0.35355338, %v114_v26  ;;  %v1465_v28 = vpop.f32.mrb[3].mxu0  ;;  %v1620_v29 = vpack.i.bf16 %v114_v26, %v111_v23  ;;  %v169_v32 = vpack.c.bf16 %v114_v26, %v114_v26  ;;  %v140_v48 = vpack.c.bf16 %v118_v25, %v118_v25 }
 0x184   :  { %1621 = vrot.lane.b32.xlu0 %v1620_v29, %s1743_s9  ;;  %1611 = vrot.lane.b32.xlu1 %v1620_v29, %s1744_s1  ;;  %v1625_v30 = vpack.i.bf16 %v119_v27, %v118_v25  ;;  %v141_v52 = vpack.c.bf16 %v119_v27, %v119_v27 }
 0x188   :  { %1616 = vrot.lane.b32.xlu1 %v1620_v29, %s1745_s10 }
 0x18c   :  { %177 = vrot.lane.b32.xlu1 %v168_v31, %s1746_s11 }
 0x190   :  { %227 = vrot.lane.b32.xlu1 %v169_v32, %s1746_s11 }
 0x1f6   :  { %v1612_v33 = vpop.permute.xlu1 %1611  ;;  %v1622_v37 = vpop.permute.xlu0 %1621 }
 0x1f7   :  { %v1613_v34 = vunpack.i.l.bf16 %v1612_v33  ;;  %v1614_v35 = vunpack.i.h.bf16 %v1612_v33  ;;  %v1623_v40 = vunpack.i.l.bf16 %v1622_v37  ;;  %v1624_v51 = vunpack.i.h.bf16 %v1622_v37 }
 0x1f9   :  { %v1836_v36 = vpack.c.bf16 %v1613_v34, %v1613_v34  ;;  %v1840_v41 = vpack.c.bf16 %v1614_v35, %v1614_v35  ;;  %v1849_v45 = vpack.c.bf16 %v1623_v40, %v1623_v40  ;;  %v1867_v53 = vpack.c.bf16 %v1624_v51, %v1624_v51 }
 0x1fa   :  { %v1617_v38 = vpop.permute.xlu1 %1616 }
 0x1fb   :  { %v1619_v39 = vunpack.i.h.bf16 %v1617_v38  ;;  %276 = vrot.lane.b32.xlu1 %v1836_v36, %s1746_s11  ;;  %v1618_v46 = vunpack.i.l.bf16 %v1617_v38 }
 0x1fd   :  { %v1842_v42 = vpack.c.bf16 %v1619_v39, %v1619_v39  ;;  %v1855_v49 = vpack.c.bf16 %v1618_v46, %v1618_v46 }
 0x1fe   :  { %v178_v43 = vpop.permute.xlu1 %177 }
 0x1ff   :  { %v184_v44 = vsel %vm179_vm2, %v178_v43, 0  ;;  %423 = vrot.lane.b32.xlu0 %v1842_v42, %s1746_s11  ;;  %325 = vrot.lane.b32.xlu1 %v1840_v41, %s1746_s11 }
 0x200   :  { %1467 = vmatpush3.bf16.xpose.msra.mxu0 %v184_v44 }
 0x201   :  { %1472 = vmatprep.subr.bf16.mxu0 %v1741_v7 }
 0x202   :  { %v228_v47 = vpop.permute.xlu1 %227 }
 0x203   :  { %472 = vrot.lane.b32.xlu0 %v1849_v45, %s1746_s11  ;;  %1626 = vrot.lane.b32.xlu1 %v1625_v30, %s1744_s1  ;;  %v233_v50 = vsel %vm179_vm2, %v228_v47, 0 }
 0x207   :  { %1469 = vmatmul.mubr.msk.bf16.vlgmr.msra.gmra.mrb[4].mxu0 %vm179_vm2, %v140_v48  ;;  %1636 = vrot.lane.b32.xlu0 %v1625_v30, %s1743_s9 }
 0x208   :  { %374 = vrot.lane.b32.xlu1 %v1855_v49, %s1746_s11  ;;  %1473 = vmatpush3.bf16.xpose.msra.mxu0 %v233_v50 }
 0x209   :  { %1474 = vmatprep.mubr.msk.bf16.mxu0 %vm1742_vm1, %v1741_v7  ;;  %1484 = vmatprep.subr.bf16.mxu0 %v1741_v7 }
 0x20b   :  { %665 = vrot.lane.b32.xlu0 %v168_v31, %s1747_s12 }
 0x20c   :  { %1631 = vrot.lane.b32.xlu1 %v1625_v30, %s1745_s10 }
 0x20f   :  { %1475 = vmatmul.mubr.msk.bf16.vlgmr.msra.gmra.mrb[8].mxu0 %vm179_vm2, %v141_v52 }
 0x210   :  { %521 = vrot.lane.b32.xlu1 %v1867_v53, %s1746_s11  ;;  %1486 = vmatprep.mubr.msk.bf16.mxu0 %vm1742_vm1, %v1741_v7 }
 0x214   :  { %714 = vrot.lane.b32.xlu1 %v169_v32, %s1747_s12 }
 0x26d   :  { %v277_v54 = vpop.permute.xlu1 %276 }
 0x26e   :  { %v282_v55 = vsel %vm179_vm2, %v277_v54, 0 }
 0x26f   :  { %1479 = vmatpush3.bf16.xpose.msra.mxu1 %v282_v55 }
 0x270   :  { %1490 = vmatprep.subr.bf16.mxu1 %v1741_v7 }
 0x271   :  { %v326_v56 = vpop.permute.xlu1 %325  ;;  %v424_v59 = vpop.permute.xlu0 %423 }
 0x272   :  { %v331_v57 = vsel %vm179_vm2, %v326_v56, 0  ;;  %v429_v2 = vsel %vm179_vm2, %v424_v59, 0 }
 0x273   :  { %1485 = vmatpush3.bf16.xpose.msra.mxu0 %v331_v57 }
 0x274   :  { %1496 = vmatprep.subr.bf16.mxu0 %v1741_v7 }
 0x275   :  { %v1627_v58 = vpop.permute.xlu1 %1626  ;;  %v473_v5 = vpop.permute.xlu0 %472 }
 0x276   :  { %v1629_v60 = vunpack.i.h.bf16 %v1627_v58  ;;  %v1628_v61 = vunpack.i.l.bf16 %v1627_v58  ;;  %v478_v14 = vsel %vm179_vm2, %v473_v5, 0 }
 0x278   :  { %v143_v62 = vpack.c.bf16 %v1629_v60, %v1629_v60  ;;  %v142_v63 = vpack.c.bf16 %v1628_v61, %v1628_v61 }
 0x279   :  { %v1637_v12 = vpop.permute.xlu0 %1636 }
 0x27a   :  { %v375_v3 = vpop.permute.xlu1 %374  ;;  %1481 = vmatmul.mubr.msk.bf16.vlgmr.msra.gmra.mrb[0].mxu1 %vm179_vm2, %v142_v63  ;;  %1487 = vmatmul.mubr.msk.bf16.vlgmr.msra.gmra.mrb[12].mxu0 %vm179_vm2, %v143_v62  ;;  %v1639_v16 = vunpack.i.h.bf16 %v1637_v12  ;;  %v1638_v17 = vunpack.i.l.bf16 %v1637_v12 }
 0x27b   :  { %v380_v4 = vsel %vm179_vm2, %v375_v3, 0  ;;  %1497 = vmatpush3.bf16.xpose.msra.mxu0 %v429_v2  ;;  %1492 = vmatprep.mubr.msk.bf16.mxu1 %vm1742_vm1, %v1741_v7 }
 0x27c   :  { %1491 = vmatpush3.bf16.xpose.msra.mxu1 %v380_v4  ;;  %1498 = vmatprep.mubr.msk.bf16.mxu0 %vm1742_vm1, %v1741_v7  ;;  %v147_v20 = vpack.c.bf16 %v1639_v16, %v1639_v16  ;;  %v146_v21 = vpack.c.bf16 %v1638_v17, %v1638_v17 }
 0x27d   :  { %1502 = vmatprep.subr.bf16.mxu1 %v1741_v7  ;;  %1508 = vmatprep.subr.bf16.mxu0 %v1741_v7  ;;  %v666_v18 = vpop.permute.xlu0 %665 }
 0x27e   :  { %v1632_v6 = vpop.permute.xlu1 %1631  ;;  %v672_v22 = vsel %vm670_vm3, %v666_v18, 0 }
 0x27f   :  { %v1634_v8 = vunpack.i.h.bf16 %v1632_v6  ;;  %v1633_v9 = vunpack.i.l.bf16 %v1632_v6 }
 0x281   :  { %v145_v10 = vpack.c.bf16 %v1634_v8, %v1634_v8  ;;  %v144_v11 = vpack.c.bf16 %v1633_v9, %v1633_v9 }
 0x282   :  { %v522_v13 = vpop.permute.xlu1 %521 }
 0x283   :  { %v527_v15 = vsel %vm179_vm2, %v522_v13, 0  ;;  %1493 = vmatmul.mubr.msk.bf16.vlgmr.msra.gmra.mrb[4].mxu1 %vm179_vm2, %v144_v11  ;;  %1499 = vmatmul.mubr.msk.bf16.vlgmr.msra.gmra.mrb[16].mxu0 %vm179_vm2, %v145_v10 }
 0x284   :  { %1503 = vmatpush3.bf16.xpose.msra.mxu1 %v478_v14  ;;  %1509 = vmatpush3.bf16.xpose.msra.mxu0 %v527_v15 }
 0x285   :  { %1504 = vmatprep.mubr.msk.bf16.mxu1 %vm1742_vm1, %v1741_v7  ;;  %1510 = vmatprep.mubr.msk.bf16.mxu0 %vm1742_vm1, %v1741_v7 }
 0x286   :  { %1514 = vmatprep.subr.bf16.mxu1 %v1741_v7  ;;  %1520 = vmatprep.subr.bf16.mxu0 %v1741_v7  ;;  %v715_v19 = vpop.permute.xlu1 %714 }
 0x287   :  { %v720_v23 = vsel %vm670_vm3, %v715_v19, 0 }
 0x28b   :  { %1505 = vmatmul.mubr.msk.bf16.vlgmr.msra.gmra.mrb[8].mxu1 %vm179_vm2, %v146_v21  ;;  %1511 = vmatmul.mubr.msk.bf16.vlgmr.msra.gmra.mrb[20].mxu0 %vm179_vm2, %v147_v20 }
 0x28c   :  { %1515 = vmatpush3.bf16.msra.mxu1 %v672_v22  ;;  %1521 = vmatpush3.bf16.msra.mxu0 %v720_v23 }
 0x28d   :  { %1516 = vmatprep.mubr.msk.bf16.mxu1 %vm1742_vm1, %v1741_v7  ;;  %1522 = vmatprep.mubr.msk.bf16.mxu0 %vm1742_vm1, %v1741_v7 }
 0x28e   :  { %1526 = vmatprep.subr.bf16.mxu1 %v1741_v7  ;;  %1532 = vmatprep.subr.bf16.mxu0 %v1741_v7 }
 0x2da   :  { %v220_v24 = vpop.f32.mrb[4].mxu0 }
 0x2db   :  { %v1470_v25 = vpop.f32.mrb[5].mxu0  ;;  %v569_v26 = vsel %vm179_vm2, %v220_v24, -inf }
 0x2dc   :  { %570 = vmax.xlane.f32.xlu1 %v569_v26  ;;  %v223_v27 = vpop.f32.mrb[6].mxu0 }
 0x2dd   :  { %v1471_v28 = vpop.f32.mrb[7].mxu0 }
 0x2e2   :  { %v269_v29 = vpop.f32.mrb[8].mxu0 }
 0x2e3   :  { %v1476_v30 = vpop.f32.mrb[9].mxu0  ;;  %v572_v31 = vsel %vm179_vm2, %v269_v29, -inf }
 0x2e4   :  { %573 = vmax.xlane.f32.xlu0 %v572_v31  ;;  %v272_v32 = vpop.f32.mrb[10].mxu0 }
 0x2e5   :  { %v1477_v33 = vpop.f32.mrb[11].mxu0 }
 0x34d   :  { %v318_v34 = vpop.f32.mrb[0].mxu1  ;;  %v367_v35 = vpop.f32.mrb[12].mxu0 }
 0x34e   :  { %v1482_v37 = vpop.f32.mrb[1].mxu1  ;;  %v1488_v38 = vpop.f32.mrb[13].mxu0  ;;  %v575_v39 = vsel %vm179_vm2, %v318_v34, -inf  ;;  %v578_v40 = vsel %vm179_vm2, %v367_v35, -inf }
 0x34f   :  { %v321_v43 = vpop.f32.mrb[2].mxu1  ;;  %576 = vmax.xlane.f32.xlu0 %v575_v39  ;;  %579 = vmax.xlane.f32.xlu1 %v578_v40  ;;  %v370_v44 = vpop.f32.mrb[14].mxu0 }
 0x350   :  { %v1483_v46 = vpop.f32.mrb[3].mxu1  ;;  %v1489_v47 = vpop.f32.mrb[15].mxu0 }
 0x356   :  { %v1913_v48 = vpop.f32.mrb[4].mxu1  ;;  %v465_v50 = vpop.f32.mrb[16].mxu0 }
 0x357   :  { %v1494_v51 = vpop.f32.mrb[5].mxu1  ;;  %v1500_v52 = vpop.f32.mrb[17].mxu0  ;;  %v581_v54 = vsel %vm179_vm2, %v1913_v48, -inf  ;;  %v584_v55 = vsel %vm179_vm2, %v465_v50, -inf }
 0x358   :  { %v419_v56 = vpop.f32.mrb[6].mxu1  ;;  %582 = vmax.xlane.f32.xlu0 %v581_v54  ;;  %585 = vmax.xlane.f32.xlu1 %v584_v55  ;;  %v468_v57 = vpop.f32.mrb[18].mxu0 }
 0x359   :  { %v1495_v58 = vpop.f32.mrb[7].mxu1  ;;  %v1501_v59 = vpop.f32.mrb[19].mxu0 }
 0x35e   :  { %v1918_v60 = vpop.f32.mrb[8].mxu1  ;;  %v563_v61 = vpop.f32.mrb[20].mxu0 }
 0x35f   :  { %v1506_v62 = vpop.f32.mrb[9].mxu1  ;;  %v1512_v63 = vpop.f32.mrb[21].mxu0  ;;  %v587_v2 = vsel %vm179_vm2, %v1918_v60, -inf  ;;  %v590_v3 = vsel %vm179_vm2, %v563_v61, -inf }
 0x360   :  { %v517_v4 = vpop.f32.mrb[10].mxu1  ;;  %588 = vmax.xlane.f32.xlu0 %v587_v2  ;;  %591 = vmax.xlane.f32.xlu1 %v590_v3  ;;  %v566_v5 = vpop.f32.mrb[22].mxu0 }
 0x361   :  { %v1507_v6 = vpop.f32.mrb[11].mxu1  ;;  %v1513_v8 = vpop.f32.mrb[23].mxu0 }
 0x369   :  { %v571_v9 = vpop.xlane.xlu1 %570 }
 0x36a   :  { %v593_v11 = vsub.f32 %v220_v24, %v571_v9 }
 0x36c   :  { %v601_v13 = vmul.f32 1.442695, %v593_v11 }
 0x36e   :  { %1673 = vpow2.f32 %v601_v13 }
 0x371   :  { %762 = vrot.lane.b32.xlu1 %v1836_v36, %s1747_s12  ;;  %v574_v10 = vpop.xlane.xlu0 %573 }
 0x372   :  { %v594_v12 = vsub.f32 %v269_v29, %v574_v10 }
 0x374   :  { %v603_v14 = vmul.f32 1.442695, %v594_v12 }
 0x376   :  { %810 = vrot.lane.b32.xlu0 %v1840_v41, %s1747_s12  ;;  %1675 = vpow2.f32 %v603_v14 }
 0x378   :  { %v1674_v15 = vpop.eup %1673 }
 0x379   :  { %v617_v17 = vsel %vm179_vm2, %v1674_v15, 0.0 }
 0x380   :  { %v1676_v16 = vpop.eup %1675 }
 0x381   :  { %v620_v18 = vsel %vm179_vm2, %v1676_v16, 0.0 }
 0x395   :  { %618 = vadd.xlane.f32.xlu0 %v617_v17  ;;  %621 = vadd.xlane.f32.xlu1 %v620_v18 }
 0x3a6   :  { %858 = vrot.lane.b32.xlu1 %v1855_v49, %s1747_s12 }
 0x3dc   :  { %v577_v36 = vpop.xlane.xlu0 %576  ;;  %v580_v41 = vpop.xlane.xlu1 %579 }
 0x3dd   :  { %v595_v19 = vsub.f32 %v318_v34, %v577_v36  ;;  %v596_v20 = vsub.f32 %v367_v35, %v580_v41 }
 0x3df   :  { %v605_v21 = vmul.f32 1.442695, %v595_v19  ;;  %v607_v22 = vmul.f32 1.442695, %v596_v20 }
 0x3e1   :  { %1677 = vpow2.f32 %v605_v21 }
 0x3e2   :  { %1679 = vpow2.f32 %v607_v22 }
 0x3e5   :  { %v586_v23 = vpop.xlane.xlu1 %585  ;;  %v583_v37 = vpop.xlane.xlu0 %582 }
 0x3e6   :  { %v598_v24 = vsub.f32 %v465_v50, %v586_v23  ;;  %v597_v38 = vsub.f32 %v1913_v48, %v583_v37 }
 0x3e8   :  { %v611_v25 = vmul.f32 1.442695, %v598_v24  ;;  %v609_v40 = vmul.f32 1.442695, %v597_v38 }
 0x3ea   :  { %1681 = vpow2.f32 %v611_v25 }
 0x3eb   :  { %v1931_v26 = vpop.eup %1677 }
 0x3ec   :  { %v1933_v27 = vpop.eup %1679  ;;  %v623_v28 = vsel %vm179_vm2, %v1931_v26, 0.0 }
 0x3ed   :  { %v592_v49 = vpop.xlane.xlu1 %591  ;;  %624 = vadd.xlane.f32.xlu0 %v623_v28  ;;  %v626_v29 = vsel %vm179_vm2, %v1933_v27, 0.0  ;;  %v589_v39 = vpop.xlane.xlu0 %588 }
 0x3ee   :  { %v600_v30 = vsub.f32 %v563_v61, %v592_v49  ;;  %627 = vadd.xlane.f32.xlu1 %v626_v29  ;;  %v599_v43 = vsub.f32 %v1918_v60, %v589_v39 }
 0x3f0   :  { %v615_v31 = vmul.f32 1.442695, %v600_v30  ;;  %v613_v44 = vmul.f32 1.442695, %v599_v43 }
 0x3f1   :  { %v811_v47 = vpop.permute.xlu0 %810  ;;  %v763_v50 = vpop.permute.xlu1 %762 }
 0x3f2   :  { %1683 = vpow2.f32 %v615_v31  ;;  %v768_v60 = vsel %vm670_vm3, %v763_v50, 0  ;;  %v816_v61 = vsel %vm670_vm3, %v811_v47, 0 }
 0x3f3   :  { %1685 = vpow2.f32 %v609_v40 }
 0x3f4   :  { %v1939_v32 = vpop.eup %1681  ;;  %1687 = vpow2.f32 %v613_v44 }
 0x3f5   :  { %v632_v33 = vsel %vm179_vm2, %v1939_v32, 0.0 }
 0x3f6   :  { %633 = vadd.xlane.f32.xlu1 %v632_v33 }
 0x3fc   :  { %v1943_v34 = vpop.eup %1683 }
 0x3fd   :  { %v638_v35 = vsel %vm179_vm2, %v1943_v34, 0.0  ;;  %v1953_v46 = vpop.eup %1685 }
 0x3fe   :  { %639 = vadd.xlane.f32.xlu1 %v638_v35  ;;  %v1957_v51 = vpop.eup %1687 }
 0x403   :  { %906 = vrot.lane.b32.xlu0 %v1842_v42, %s1747_s12  ;;  %v629_v42 = vsel %vm179_vm2, %v1953_v46, 0.0 }
 0x40f   :  { %954 = vrot.lane.b32.xlu1 %v1849_v45, %s1747_s12  ;;  %v635_v45 = vsel %vm179_vm2, %v1957_v51, 0.0 }
 0x422   :  { %v619_v48 = vpop.xlane.xlu0 %618  ;;  %v622_v52 = vpop.xlane.xlu1 %621  ;;  %630 = vadd.xlane.f32.xlu0 %v629_v42 }
 0x423   :  { %1689 = vrcp.f32 %v619_v48 }
 0x424   :  { %1691 = vrcp.f32 %v622_v52 }
 0x426   :  { %636 = vadd.xlane.f32.xlu0 %v635_v45  ;;  %v859_v62 = vpop.permute.xlu1 %858 }
 0x427   :  { %v864_v12 = vsel %vm670_vm3, %v859_v62, 0  ;;  %v1658_v62 = vld [vmem:[%s2095_s3 + $0x8] sm:$0xff]  }
 0x42d   :  { %v1690_v54 = vpop.eup %1689 }
 0x42e   :  { %v1692_v55 = vpop.eup %1691  ;;  %v649_v56 = vmul.f32 %v1690_v54, %v1674_v15  ;;  %v1657_v54 = vld [vmem:[%s2095_s3] sm:$0xff]  }
 0x42f   :  { %v650_v57 = vmul.f32 %v1692_v55, %v1676_v16 }
 0x430   :  { %v657_v58 = vpack.c.bf16 %v649_v56, %v649_v56 }
 0x431   :  { %v658_v59 = vpack.c.bf16 %v650_v57, %v650_v57 }
 0x432   :  { %1517 = vmatmul.mubr.msk.bf16.vlgmr.msra.gmra.mrb[12].mxu1 %vm179_vm2, %v657_v58 }
 0x433   :  { %1523 = vmatmul.mubr.msk.bf16.vlgmr.msra.gmra.mrb[24].mxu0 %vm179_vm2, %v658_v59  ;;  %1527 = vmatpush3.bf16.msra.mxu1 %v768_v60 }
 0x434   :  { %1533 = vmatpush3.bf16.msra.mxu0 %v816_v61  ;;  %1528 = vmatprep.mubr.msk.bf16.mxu1 %vm1742_vm1, %v1741_v7 }
 0x435   :  { %1534 = vmatprep.mubr.msk.bf16.mxu0 %vm1742_vm1, %v1741_v7  ;;  %1538 = vmatprep.subr.bf16.mxu1 %v1741_v7 }
 0x436   :  { %1544 = vmatprep.subr.bf16.mxu0 %v1741_v7 }
 0x43c   :  { %1002 = vrot.lane.b32.xlu0 %v1867_v53, %s1747_s12 }
 0x47a   :  { %v625_v63 = vpop.xlane.xlu0 %624 }
 0x47b   :  { %1693 = vrcp.f32 %v625_v63  ;;  %v628_v2 = vpop.xlane.xlu1 %627 }
 0x47c   :  { %1695 = vrcp.f32 %v628_v2 }
 0x47e   :  { %v907_v9 = vpop.permute.xlu0 %906 }
 0x47f   :  { %v912_v53 = vsel %vm670_vm3, %v907_v9, 0 }
 0x483   :  { %v634_v3 = vpop.xlane.xlu1 %633 }
 0x484   :  { %1697 = vrcp.f32 %v634_v3 }
 0x485   :  { %v1694_v4 = vpop.eup %1693 }
 0x486   :  { %v1696_v5 = vpop.eup %1695  ;;  %v651_v6 = vmul.f32 %v1694_v4, %v1931_v26 }
 0x487   :  { %v652_v8 = vmul.f32 %v1696_v5, %v1933_v27 }
 0x488   :  { %v659_v10 = vpack.c.bf16 %v651_v6, %v651_v6 }
 0x489   :  { %v660_v11 = vpack.c.bf16 %v652_v8, %v652_v8 }
 0x48a   :  { %1529 = vmatmul.mubr.msk.bf16.vlgmr.msra.gmra.mrb[16].mxu1 %vm179_vm2, %v659_v10 }
 0x48b   :  { %1535 = vmatmul.mubr.msk.bf16.vlgmr.msra.gmra.mrb[28].mxu0 %vm179_vm2, %v660_v11  ;;  %1539 = vmatpush3.bf16.msra.mxu1 %v864_v12  ;;  %v640_v16 = vpop.xlane.xlu1 %639 }
 0x48c   :  { %1545 = vmatpush3.bf16.msra.mxu0 %v912_v53  ;;  %1546 = vmatprep.mubr.msk.bf16.mxu0 %vm1742_vm1, %v1741_v7  ;;  %1699 = vrcp.f32 %v640_v16 }
 0x48d   :  { %1556 = vmatprep.subr.bf16.mxu0 %v1741_v7  ;;  %1540 = vmatprep.mubr.msk.bf16.mxu1 %vm1742_vm1, %v1741_v7 }
 0x48e   :  { %1550 = vmatprep.subr.bf16.mxu1 %v1741_v7  ;;  %v1698_v13 = vpop.eup %1697 }
 0x48f   :  { %v654_v14 = vmul.f32 %v1698_v13, %v1939_v32  ;;  %v955_v24 = vpop.permute.xlu1 %954 }
 0x490   :  { %v960_v27 = vsel %vm670_vm3, %v955_v24, 0 }
 0x491   :  { %v662_v15 = vpack.c.bf16 %v654_v14, %v654_v14 }
 0x493   :  { %1547 = vmatmul.mubr.msk.bf16.vlgmr.msra.gmra.mrb[32].mxu0 %vm179_vm2, %v662_v15 }
 0x494   :  { %1558 = vmatprep.mubr.msk.bf16.mxu0 %vm1742_vm1, %v1741_v7 }
 0x496   :  { %v1700_v18 = vpop.eup %1699 }
 0x497   :  { %v656_v41 = vmul.f32 %v1700_v18, %v1943_v34 }
 0x499   :  { %v664_v22 = vpack.c.bf16 %v656_v41, %v656_v41 }
 0x4af   :  { %v631_v17 = vpop.xlane.xlu0 %630 }
 0x4b0   :  { %1701 = vrcp.f32 %v631_v17 }
 0x4b3   :  { %v637_v36 = vpop.xlane.xlu0 %636 }
 0x4b4   :  { %1703 = vrcp.f32 %v637_v36 }
 0x4b7   :  { %v1003_v19 = vpop.permute.xlu0 %1002 }
 0x4b8   :  { %v1008_v20 = vsel %vm670_vm3, %v1003_v19, 0 }
 0x4b9   :  { %1557 = vmatpush3.bf16.msra.mxu0 %v1008_v20 }
 0x4ba   :  { %v1702_v21 = vpop.eup %1701  ;;  %1570 = vmatprep.subr.bf16.mxu0 %v1741_v7 }
 0x4bb   :  { %v653_v23 = vmul.f32 %v1702_v21, %v1953_v46 }
 0x4bc   :  { %1559 = vmatmul.mubr.msk.bf16.vlgmr.msra.gmra.mrb[36].mxu0 %vm179_vm2, %v664_v22 }
 0x4bd   :  { %v661_v25 = vpack.c.bf16 %v653_v23, %v653_v23  ;;  %1574 = vmatprep.mubr.msk.bf16.mxu0 %vm1742_vm1, %v1741_v7 }
 0x4be   :  { %v1704_v26 = vpop.eup %1703 }
 0x4bf   :  { %1541 = vmatmul.mubr.msk.bf16.vlgmr.msra.gmra.mrb[20].mxu1 %vm179_vm2, %v661_v25  ;;  %v655_v28 = vmul.f32 %v1704_v26, %v1957_v51 }
 0x4c0   :  { %1551 = vmatpush3.bf16.msra.mxu1 %v960_v27  ;;  %1552 = vmatprep.mubr.msk.bf16.mxu1 %vm1742_vm1, %v1741_v7 }
 0x4c1   :  { %1562 = vmatprep.subr.bf16.mxu1 %v1741_v7  ;;  %v663_v49 = vpack.c.bf16 %v655_v28, %v655_v28 }
 0x4c7   :  { %1553 = vmatmul.mubr.msk.bf16.vlgmr.msra.gmra.mrb[24].mxu1 %vm179_vm2, %v663_v49 }
 0x4c8   :  { %1566 = vmatprep.mubr.msk.bf16.mxu1 %vm1742_vm1, %v1741_v7  ;;  %1563 = vmatpush3.bf16.msra.mxu1 %v1657_v54  ;;  %v1666_v54 = vld [vmem:[%s2098_s6 + $0x28] sm:$0xff]  }
 0x4c9   :  { %1564 = vmatprep.subr.bf16.mxu1 %v1741_v7 }
 0x4cc   :  { %1565 = vmatpush3.bf16.msra.mxu1 %v1658_v62 }
 0x4cd   :  { %1578 = vmatprep.subr.bf16.mxu1 %v1741_v7 }
 0x505   :  { %v708_v29 = vpop.f32.mrb[12].mxu1 }
 0x506   :  { %v756_v30 = vpop.f32.mrb[24].mxu0  ;;  %v1518_v31 = vpop.f32.mrb[13].mxu1 }
 0x507   :  { %v1524_v32 = vpop.f32.mrb[25].mxu0  ;;  %v711_v33 = vpop.f32.mrb[14].mxu1 }
 0x508   :  { %v759_v34 = vpop.f32.mrb[26].mxu0  ;;  %v1519_v35 = vpop.f32.mrb[15].mxu1 }
 0x509   :  { %v1525_v37 = vpop.f32.mrb[27].mxu0 }
 0x55d   :  { %v804_v38 = vpop.f32.mrb[16].mxu1 }
 0x55e   :  { %v852_v39 = vpop.f32.mrb[28].mxu0  ;;  %v1530_v40 = vpop.f32.mrb[17].mxu1 }
 0x55f   :  { %v1640_v43 = vpack.i.bf16 %v852_v39, %v804_v38  ;;  %v1536_v44 = vpop.f32.mrb[29].mxu0  ;;  %v807_v46 = vpop.f32.mrb[18].mxu1 }
 0x560   :  { %v855_v47 = vpop.f32.mrb[30].mxu0  ;;  %v1531_v50 = vpop.f32.mrb[19].mxu1 }
 0x561   :  { %1641 = vrot.lane.b32.xlu1 %v1640_v43, %s1748_s13  ;;  %v1537_v42 = vpop.f32.mrb[31].mxu0  ;;  %v1394_v43 = vld [vmem:[%s2096_s4] ss:$0 sm:$0xff] }
 0x562   :  { %v1661_v42 = vld [vmem:[%s2098_s6] sm:$0xff]  }
 0x566   :  { %v948_v51 = vpop.f32.mrb[32].mxu0 }
 0x567   :  { %v1548_v48 = vpop.f32.mrb[33].mxu0 }
 0x568   :  { %v951_v52 = vpop.f32.mrb[34].mxu0  ;;  %v1663_v48 = vld [vmem:[%s2098_s6 + $0x10] sm:$0xff]  }
 0x569   :  { %v1549_v45 = vpop.f32.mrb[35].mxu0  ;;  %v1664_v52 = vld [vmem:[%s2098_s6 + $0x18] sm:$0xff]  }
 0x56a   :  { %v1665_v45 = vld [vmem:[%s2098_s6 + $0x20] sm:$0xff]  }
 0x58f   :  { %v1044_v55 = vpop.f32.mrb[36].mxu0 }
 0x590   :  { %v1560_v56 = vpop.f32.mrb[37].mxu0 }
 0x591   :  { %v1047_v57 = vpop.f32.mrb[38].mxu0  ;;  %v1668_v56 = vld [vmem:[%s2098_s6 + $0x38] sm:$0xff]  }
 0x592   :  { %v900_v58 = vpop.f32.mrb[20].mxu1  ;;  %v1561_v59 = vpop.f32.mrb[39].mxu0 }
 0x593   :  { %v1645_v60 = vpack.i.bf16 %v948_v51, %v900_v58  ;;  %v1542_v61 = vpop.f32.mrb[21].mxu1  ;;  %v1662_v51 = vld [vmem:[%s2098_s6 + $0x8] sm:$0xff]  }
 0x594   :  { %v903_v63 = vpop.f32.mrb[22].mxu1 }
 0x595   :  { %v1543_v2 = vpop.f32.mrb[23].mxu1  ;;  %1646 = vrot.lane.b32.xlu0 %v1645_v60, %s1749_s18 }
 0x59a   :  { %v996_v3 = vpop.f32.mrb[24].mxu1 }
 0x59b   :  { %v1650_v4 = vpack.i.bf16 %v1044_v55, %v996_v3  ;;  %v1554_v5 = vpop.f32.mrb[25].mxu1  ;;  %v1667_v55 = vld [vmem:[%s2098_s6 + $0x30] sm:$0xff]   ;;  %s1751_s6 = smov [#allocation2]  }
 0x59c   :  { %v999_v6 = vpop.f32.mrb[26].mxu1  ;;  %s1360_s14 = sshll.u32 %s1751_s6, 4  ;;  %s1361_s14 = int_to_ptr.vmem [resolvable:$true] %s1360_s14 }
 0x59d   :  { %v1555_v8 = vpop.f32.mrb[27].mxu1  ;;  %1651 = vrot.lane.b32.xlu1 %v1650_v4, %s1750_s19  ;;  %s1717_s15 = scalar_lea.vmem %s1361_s14, 256  ;;  %p1722_p1 = scmp.lt.s32.totalorder %s1361_s14, %s1361_s14 }
 0x59e   :  { %p1718_p0 = scmp.ne.s32.totalorder %s1361_s14, %s1717_s15  ;;  %p1723_p2 = scmp.lt.s32.totalorder %s1717_s15, %s1717_s15 }
 0x5a0   :  { %p1724_p3 = por %p1723_p2, %p1722_p1 }
 0x5a2   :  { %p1725_p4 = pnand %p1724_p3, %p1718_p0 }
 0x5d3   :  { %v1642_v9 = vpop.permute.xlu1 %1641 }
 0x5d4   :  { %v1644_v11 = vunpack.i.h.bf16 %v1642_v9  ;;  %v1643_v12 = vunpack.i.l.bf16 %v1642_v9 }
 0x5d6   :  { %v1075_v15 = vsel %vm179_vm2, %v756_v30, %v1644_v11  ;;  %v1074_v16 = vsel %vm179_vm2, %v708_v29, %v1643_v12 }
 0x607   :  { %v1647_v10 = vpop.permute.xlu0 %1646 }
 0x608   :  { %v1649_v53 = vunpack.i.h.bf16 %v1647_v10  ;;  %v1648_v13 = vunpack.i.l.bf16 %v1647_v10 }
 0x60a   :  { %v1078_v36 = vsel %vm1076_vm4, %v1075_v15, %v1649_v53  ;;  %v1077_v41 = vsel %vm1076_vm4, %v1074_v16, %v1648_v13 }
 0x60f   :  { %v1652_v14 = vpop.permute.xlu1 %1651 }
 0x610   :  { %v1654_v17 = vunpack.i.h.bf16 %v1652_v14  ;;  %v1653_v18 = vunpack.i.l.bf16 %v1652_v14 }
 0x612   :  { %v1081_v19 = vsel %vm1079_vm5, %v1078_v36, %v1654_v17  ;;  %v1080_v20 = vsel %vm1079_vm5, %v1077_v41, %v1653_v18 }
 0x613   :  { %v1082_v21 = vpack.c.bf16 %v1081_v19, %v1080_v20 }
 0x615   :  { %1567 = vmatmul.mubr.msk.bf16.vlgmr.msra.gmra.mrb[28].mxu1 %vm33_vm0, %v1082_v21 }
 0x616   :  { %1594 = vmatprep.mubr.msk.bf16.mxu1 %vm1742_vm1, %v1741_v7  ;;  %1579 = vmatpush3.bf16.msra.mxu1 %v1661_v42 }
 0x617   :  { %1580 = vmatprep.subr.bf16.mxu1 %v1741_v7 }
 0x61a   :  { %1581 = vmatpush3.bf16.msra.mxu1 %v1662_v51 }
 0x61b   :  { %1582 = vmatprep.subr.bf16.mxu1 %v1741_v7 }
 0x61e   :  { %1583 = vmatpush3.bf16.msra.mxu1 %v1663_v48 }
 0x61f   :  { %1584 = vmatprep.subr.bf16.mxu1 %v1741_v7 }
 0x622   :  { %1585 = vmatpush3.bf16.msra.mxu1 %v1664_v52 }
 0x623   :  { %1586 = vmatprep.subr.bf16.mxu1 %v1741_v7 }
 0x626   :  { %1587 = vmatpush3.bf16.msra.mxu1 %v1665_v45 }
 0x627   :  { %1588 = vmatprep.subr.bf16.mxu1 %v1741_v7 }
 0x62a   :  { %1589 = vmatpush3.bf16.msra.mxu1 %v1666_v54 }
 0x62b   :  { %1590 = vmatprep.subr.bf16.mxu1 %v1741_v7 }
 0x62e   :  { %1591 = vmatpush3.bf16.msra.mxu1 %v1667_v55 }
 0x62f   :  { %1592 = vmatprep.subr.bf16.mxu1 %v1741_v7 }
 0x632   :  { %1593 = vmatpush3.bf16.msra.mxu1 %v1668_v56 }
 0x6e8   :  { %v1136_v22 = vpop.f32.mrb[28].mxu1 }
 0x6e9   :  { %v2020_v23 = vadd.f32 %v1136_v22, %v1796_v0  ;;  %v1568_v24 = vpop.f32.mrb[29].mxu1  ;;  %v1659_v0 = vld [vmem:[%s2097_s5] sm:$0xff]  }
 0x6ea   :  { %v1139_v25 = vpop.f32.mrb[30].mxu1  ;;  %1571 = vmatpush3.bf16.msra.mxu0 %v1659_v0 }
 0x6eb   :  { %v2023_v26 = vadd.f32 %v1139_v25, %v1801_v1  ;;  %v1569_v27 = vpop.f32.mrb[31].mxu1  ;;  %v1146_v28 = vmul.f32 %v2020_v23, %v2020_v23  ;;  %v1660_v1 = vld [vmem:[%s2097_s5 + $0x8] sm:$0xff]   ;;  %1572 = vmatprep.subr.bf16.mxu0 %v1741_v7 }
 0x6ed   :  { %v1148_v49 = vsel %vm33_vm0, %v1146_v28, 0.0  ;;  %v1147_v29 = vmul.f32 %v2023_v26, %v2023_v26 }
 0x6ee   :  { %1149 = vadd.xlane.f32.xlu0 %v1148_v49  ;;  %1573 = vmatpush3.bf16.msra.mxu0 %v1660_v1 }
 0x6ef   :  { %v1151_v30 = vsel %vm33_vm0, %v1147_v29, 0.0 }
 0x6f0   :  { %1152 = vadd.xlane.f32.xlu1 %v1151_v30 }
 0x77b   :  { %v1150_v31 = vpop.xlane.xlu0 %1149 }
 0x77c   :  { %v1154_v32 = vmul.f32 0.03125, %v1150_v31 }
 0x77d   :  { %v1153_v33 = vpop.xlane.xlu1 %1152 }
 0x77e   :  { %v1156_v34 = vadd.f32 1e-06, %v1154_v32  ;;  %v1155_v35 = vmul.f32 0.03125, %v1153_v33 }
 0x780   :  { %1705 = vrsqrt.f32 %v1156_v34  ;;  %v1157_v37 = vadd.f32 1e-06, %v1155_v35 }
 0x782   :  { %1707 = vrsqrt.f32 %v1157_v37 }
 0x78a   :  { %v1706_v38 = vpop.eup %1705 }
 0x78b   :  { %v1160_v39 = vmul.f32 %v1706_v38, %v2020_v23 }
 0x78c   :  { %v1708_v40 = vpop.eup %1707 }
 0x78d   :  { %v1161_v44 = vmul.f32 %v1708_v40, %v2023_v26  ;;  %v1168_v46 = vmul.f32 %v1394_v43, %v1160_v39 }
 0x78f   :  { %v1169_v47 = vmul.f32 %v1394_v43, %v1161_v44 }
 0x791   :  { %v1170_v50 = vpack.c.bf16 %v1169_v47, %v1168_v46 }
 0x793   :  { %1575 = vmatmul.mubr.msk.bf16.vlgmr.msra.gmra.mrb[40].mxu0 %vm33_vm0, %v1170_v50 }
 0x866   :  { %v1224_v57 = vpop.f32.mrb[40].mxu0 }
 0x867   :  { %v1398_v58 = vmul.f32 -1.442695, %v1224_v57  ;;  %v1576_v59 = vpop.f32.mrb[41].mxu0 }
 0x868   :  { %v1227_v60 = vpop.f32.mrb[42].mxu0 }
 0x869   :  { %1709 = vpow2.f32 %v1398_v58  ;;  %v1399_v61 = vmul.f32 -1.442695, %v1227_v60  ;;  %v1577_v62 = vpop.f32.mrb[43].mxu0 }
 0x86b   :  { %1711 = vpow2.f32 %v1399_v61 }
 0x873   :  { %v1710_v63 = vpop.eup %1709 }
 0x874   :  { %v1237_v2 = vadd.f32 1.0, %v1710_v63 }
 0x875   :  { %v1712_v3 = vpop.eup %1711 }
 0x876   :  { %1713 = vrcp.f32 %v1237_v2  ;;  %v1238_v4 = vadd.f32 1.0, %v1712_v3 }
 0x878   :  { %1715 = vrcp.f32 %v1238_v4 }
 0x880   :  { %v1714_v7 = vpop.eup %1713 }
 0x881   :  { %v1243_v6 = vmul.f32 %v1714_v7, %v1224_v57 }
 0x882   :  { %v1716_v5 = vpop.eup %1715 }
 0x883   :  { %v1244_v8 = vmul.f32 %v1716_v5, %v1227_v60 }
 0x885   :  { %v1245_v9 = vpack.c.bf16 %v1244_v8, %v1243_v6 }
 0x887   :  { %1595 = vmatmul.mubr.bf16.vlgmr.msra.gmra.mrb[32].mxu1 %v1245_v9 }
 0x95a   :  { %v1344_v10 = vpop.f32.mrb[32].mxu1 }
 0x95b   :  { %v1351_v11 = vadd.f32 %v1344_v10, %v2020_v23  ;;  %v1596_v12 = vpop.f32.mrb[33].mxu1 }
 0x95c   :  { %v1347_v53 = vpop.f32.mrb[34].mxu1 }
 0x95d   :  { %1353 = vst.msk [vmem:[#allocation2] sm:$0xff] %vm33_vm0, %v1351_v11  ;;  %v1352_v13 = vadd.f32 %v1347_v53, %v2023_v26  ;;  %v1597_v14 = vpop.f32.mrb[35].mxu1 }
 0x95f   :  { %1354 = vst.msk [vmem:[#allocation2 + $0x8] sm:$0xff] %vm33_vm0, %v1352_v13 }
 0x960   :  { %1728 = shalt.err (!%p1725_p4)
}
 0x961   :  { %s1729_s18 = scalar_lea.hbm %s2099_s7, 256 }
 0x962   :  { %p1730_p5 = scmp.ne.s32.totalorder %s2099_s7, %s1729_s18  ;;  %p1733_p6 = scmp.lt.u32.totalorder %s1729_s18, %s2099_s7 }
 0x964   :  { %p1735_p7 = pnand %p1733_p6, %p1730_p5 }
 0x966   :  { %1738 = shalt.err (!%p1735_p7)
}
 0x967   :  { %s1752_s22 = smov 128  }
 0x968   :  { %1366 = dma.vmem_to_hbm [thread:$0]  %s1361_s14, 256, %s2099_s7, [#allocation3], %s1752_s22, %s1752_s22, %s1748_s13  }
 0x969   :  { %1739 = dma.done.wait [#allocation3], 256  }
 0x96a   :  { %1740 = vsyncadd [#allocation3], 4294967040 }
 0x96b   :  { %1370 = vsyncpa [#allocation3], 1 }

</bundles_post_ra>
